<compile_context>
chip_gen: v5e
topology: v5e:2x2
jax: 0.10.0
libtpu: 0.0.40
codegen_flags: <defaults>
</compile_context>

<pallas_src>
import functools

import jax
import jax.numpy as jnp
from jax.experimental import pallas as pl
from jax.experimental.pallas import tpu as pltpu

_MIB = 1024 * 1024


def _round_up(x, m):
    return ((x + m - 1) // m) * m


def _vmem_capacity_bytes():
    try:
        cap = int(pltpu.get_tpu_info().vmem_capacity_bytes)
        if cap >= 32 * _MIB:
            return cap
    except Exception:
        pass
    return 64 * _MIB            # conservative fallback (v7x-sized VMEM)


_VMEM_CAP = _vmem_capacity_bytes()
# Resident working-set budget + the scoped limit requested from Mosaic, with
# headroom for compiler scratch (v7x ~44/54 MiB; v5e/v6e ~89/108 MiB).
_RESIDENT_BUDGET = min(int(0.70 * _VMEM_CAP), _VMEM_CAP - 12 * _MIB)
_VMEM_LIMIT = min(int(0.85 * _VMEM_CAP), _VMEM_CAP - 8 * _MIB)


def _resident_bytes(n_pad, f_pad):
    # bf16 A_hat + bf16 h + f32 matmul temporaries + f32 output buffers,
    # single-buffered (manual DMA, grid=(1,)).
    return n_pad * n_pad * 2 + n_pad * f_pad * (2 + 4 + 2 * 4)


def _feat_resident_bytes(n_pad, f_pad, tile_m, tile_k):
    return (n_pad * f_pad * 2            # resident bf16 h scratch
            + 2 * n_pad * f_pad * 2      # resident bf16 out block (<=2 bufs)
            + tile_m * f_pad * 4         # f32 accumulator
            + 2 * tile_m * tile_k * 2)   # streamed A_hat blocks (x2 buffers)


def _choose_tiles(n, f_pad, budget):
    """Large, asymmetric (TILE_M, TILE_K) sized from f_pad and a VMEM budget."""
    n128 = _round_up(n, 128)
    for tm in (2048, 1024, 512, 256, 128):
        if tm > max(128, n128):
            continue
        if tm > 128:
            n_pad_t = _round_up(n128, tm)
            # keep >=2 dst tiles (v7x megacore) and <=25% row padding waste
            if n_pad_t // tm < 2 or n_pad_t > n128 + n128 // 4:
                continue
        for tk in (512, 256, 128):
            if tk > tm or tm % tk:
                continue
            need = (2 * tm * tk * 2          # adj blocks (bf16, double-buffered)
                    + 2 * tk * f_pad * 2     # h blocks   (bf16, double-buffered)
                    + 2 * tm * f_pad * 2     # out blocks (bf16, double-buffered)
                    + tm * f_pad * 4)        # f32 accumulator
            if need <= budget:
                return tm, tk
    return 128, 128


# -----------------------------------------------------------------------------
# Kernels
# -----------------------------------------------------------------------------
def _sgc_resident_kernel(a_hbm, feat_hbm, out_ref, a_vmem, h_vmem, sem, *, k):
    """A_hat and h resident in VMEM (single-buffered); all k hops in one call."""
    cp_a = pltpu.make_async_copy(a_hbm, a_vmem, sem.at[0])
    cp_f = pltpu.make_async_copy(feat_hbm, h_vmem, sem.at[1])
    cp_a.start()
    cp_f.start()
    cp_a.wait()
    cp_f.wait()

    a = a_vmem[...]                      # (Np, Np) bf16 = D^-1/2 A D^-1/2
    h = h_vmem[...]                      # (Np, Fp) bf16
    acc = None
    for _ in range(k):                   # k is a static int -> unrolled
        acc = jnp.dot(a, h, preferred_element_type=jnp.float32)   # MXU, f32 acc
        h = acc.astype(jnp.bfloat16)
    out_ref[...] = acc.astype(out_ref.dtype)


def _sgc_feat_resident_kernel(feat_hbm, adj_ref, out_ref, h_ref, acc_ref, sem,
                              *, k, tile_m, tile_k):
    """h + accumulator resident in VMEM; A_hat streamed over (k, dst, src)."""
    hop = pl.program_id(0)
    i = pl.program_id(1)
    kk = pl.program_id(2)
    n_dst = pl.num_programs(1)
    n_src = pl.num_programs(2)

    @pl.when((hop == 0) & (i == 0) & (kk == 0))
    def _load_features():
        cp = pltpu.make_async_copy(feat_hbm, h_ref, sem.at[0])
        cp.start()
        cp.wait()

    @pl.when(kk == 0)
    def _init_acc():
        acc_ref[...] = jnp.zeros_like(acc_ref)

    src0 = pl.multiple_of(kk * tile_k, tile_k)
    acc_ref[...] += jnp.dot(adj_ref[...], h_ref[pl.ds(src0, tile_k), :],
                            preferred_element_type=jnp.float32)

    @pl.when(kk == n_src - 1)
    def _finalize_tile():
        dst0 = pl.multiple_of(i * tile_m, tile_m)
        out_ref[pl.ds(dst0, tile_m), :] = acc_ref[...].astype(out_ref.dtype)

    @pl.when((hop < k - 1) & (i == n_dst - 1) & (kk == n_src - 1))
    def _next_hop():
        h_ref[...] = out_ref[...]        # bf16 VMEM copy: next hop's input


def _sgc_hop_kernel(adj_ref, h_ref, out_ref, acc_ref):
    """One hop of A_hat @ h, tiled over (dst_tiles, src_tiles)."""
    kk = pl.program_id(1)

    @pl.when(kk == 0)
    def _init():
        acc_ref[...] = jnp.zeros_like(acc_ref)

    acc_ref[...] += jnp.dot(adj_ref[...], h_ref[...],
                            preferred_element_type=jnp.float32)

    @pl.when(kk == pl.num_programs(1) - 1)
    def _finalize():
        out_ref[...] = acc_ref[...].astype(out_ref.dtype)


# -----------------------------------------------------------------------------
# Wrapper
# -----------------------------------------------------------------------------
@functools.partial(jax.jit, static_argnames=("k", "tile_m", "tile_k", "mode"))
def sgc_agg(adj, feat, k=1, *, tile_m=None, tile_k=None, mode="auto"):
    """SGC aggregation: (D^{-1/2} A D^{-1/2})^k @ feat.

    adj:  [N, N] dense adjacency (adj[i, u] = 1 iff edge u -> i); in-degree
          based normalization on both sides, matching DGL SGConv.
    feat: [N, F] node features.
    """
    n, f = feat.shape
    assert adj.shape == (n, n)
    assert mode in ("auto", "resident", "feat_resident", "tiled")
    if k == 0:
        return feat

    out_dtype = feat.dtype
    f_pad = _round_up(f, 128)
    n128 = _round_up(n, 128)

    # ---- static tile / mode selection --------------------------------------
    if tile_m is None or tile_k is None:
        tile_m, tile_k = _choose_tiles(n, f_pad, max(_VMEM_LIMIT - 4 * _MIB,
                                                     8 * _MIB))
    assert tile_m % 128 == 0 and tile_k % 128 == 0 and tile_m % tile_k == 0

    if mode == "auto":
        if _resident_bytes(n128, f_pad) <= _RESIDENT_BUDGET:
            mode = "resident"
        elif _feat_resident_bytes(n128, f_pad, tile_m, tile_k) <= _RESIDENT_BUDGET:
            mode = "feat_resident"
        else:
            mode = "tiled"

    n_pad = n128 if mode == "resident" else _round_up(n, tile_m)

    # ---- prologue: fold D^{-1/2} into a bf16 normalized adjacency ----------
    # TODO(synk): SGC_Agg(cached=True), the optional post-`norm` module and the
    # zero-in-degree DGLError are framework/host-side state, not kernel work;
    # callers that reuse the graph should cache `a_hat` across calls.
    adj32 = adj.astype(jnp.float32)
    degs = jnp.maximum(jnp.sum(adj32, axis=1), 1.0)          # in-degrees, clamped
    norm = jax.lax.rsqrt(degs)
    a_hat = (norm[:, None] * adj32 * norm[None, :]).astype(jnp.bfloat16)
    feat_bf = feat.astype(jnp.bfloat16)

    if n_pad != n:
        a_hat = jnp.zeros((n_pad, n_pad), jnp.bfloat16).at[:n, :n].set(a_hat)
    if (n_pad, f_pad) != (n, f):
        feat_bf = jnp.zeros((n_pad, f_pad), jnp.bfloat16).at[:n, :f].set(feat_bf)

    flops = int(2 * k * n_pad * n_pad * f_pad)

    # ---- path 1: everything resident in VMEM --------------------------------
    if mode == "resident":
        out_p = pl.pallas_call(
            functools.partial(_sgc_resident_kernel, k=k),
            out_shape=jax.ShapeDtypeStruct((n_pad, f_pad), jnp.float32),
            grid_spec=pltpu.PrefetchScalarGridSpec(
                num_scalar_prefetch=0,
                grid=(1,),
                in_specs=[pl.BlockSpec(memory_space=pl.ANY),     # A_hat (HBM)
                          pl.BlockSpec(memory_space=pl.ANY)],    # feat  (HBM)
                out_specs=pl.BlockSpec((n_pad, f_pad), lambda i: (0, 0)),
                scratch_shapes=[
                    pltpu.VMEM((n_pad, n_pad), jnp.bfloat16),    # A_hat, 1 buf
                    pltpu.VMEM((n_pad, f_pad), jnp.bfloat16),    # h, 1 buf
                    pltpu.SemaphoreType.DMA((2,)),
                ],
            ),
            compiler_params=pltpu.CompilerParams(
                dimension_semantics=("arbitrary",),
                vmem_limit_bytes=_VMEM_LIMIT),
            cost_estimate=pl.CostEstimate(
                flops=flops, transcendentals=0,
                bytes_accessed=int(2 * n_pad * n_pad + 6 * n_pad * f_pad)),
        )(a_hat, feat_bf)
        return out_p[:n, :f].astype(out_dtype)

    # ---- path 2: features resident, adjacency streamed ----------------------
    if mode == "feat_resident":
        grid = (k, n_pad // tile_m, n_pad // tile_k)
        out_p = pl.pallas_call(
            functools.partial(_sgc_feat_resident_kernel,
                              k=k, tile_m=tile_m, tile_k=tile_k),
            out_shape=jax.ShapeDtypeStruct((n_pad, f_pad), jnp.bfloat16),
            grid_spec=pltpu.PrefetchScalarGridSpec(
                num_scalar_prefetch=0,
                grid=grid,
                in_specs=[
                    pl.BlockSpec(memory_space=pl.ANY),                 # feat
                    pl.BlockSpec((tile_m, tile_k),
                                 lambda hop, i, kk: (i, kk)),          # A_hat
                ],
                out_specs=pl.BlockSpec((n_pad, f_pad),
                                       lambda hop, i, kk: (0, 0)),
                scratch_shapes=[
                    pltpu.VMEM((n_pad, f_pad), jnp.bfloat16),   # resident h
                    pltpu.VMEM((tile_m, f_pad), jnp.float32),   # accumulator
                    pltpu.SemaphoreType.DMA((1,)),
                ],
            ),
            compiler_params=pltpu.CompilerParams(
                dimension_semantics=("arbitrary", "arbitrary", "arbitrary"),
                vmem_limit_bytes=_VMEM_LIMIT),
            cost_estimate=pl.CostEstimate(
                flops=flops, transcendentals=0,
                bytes_accessed=int(k * n_pad * n_pad * 2 + 4 * n_pad * f_pad)),
        )(feat_bf, a_hat)
        return out_p[:n, :f].astype(out_dtype)

    # ---- path 3: fully tiled streaming, one pallas_call per hop -------------
    grid = (n_pad // tile_m, n_pad // tile_k)
    hop_call = pl.pallas_call(
        _sgc_hop_kernel,
        out_shape=jax.ShapeDtypeStruct((n_pad, f_pad), jnp.bfloat16),
        grid_spec=pltpu.PrefetchScalarGridSpec(
            num_scalar_prefetch=0,
            grid=grid,
            in_specs=[
                pl.BlockSpec((tile_m, tile_k), lambda i, kk: (i, kk)),   # A_hat
                pl.BlockSpec((tile_k, f_pad), lambda i, kk: (kk, 0)),    # h bf16
            ],
            out_specs=pl.BlockSpec((tile_m, f_pad), lambda i, kk: (i, 0)),
            scratch_shapes=[pltpu.VMEM((tile_m, f_pad), jnp.float32)],
        ),
        compiler_params=pltpu.CompilerParams(
            dimension_semantics=("parallel", "arbitrary"),
            vmem_limit_bytes=_VMEM_LIMIT),
        cost_estimate=pl.CostEstimate(
            flops=flops // k, transcendentals=0,
            bytes_accessed=int(n_pad * n_pad * 2
                               + grid[0] * n_pad * f_pad * 2
                               + n_pad * f_pad * 2)),
    )

    h = feat_bf
    for _ in range(k):
        h = hop_call(a_hat, h)            # bf16 inter-hop state (halved HBM)
    return h[:n, :f].astype(out_dtype)


# -----------------------------------------------------------------------------
# Pure-JAX reference (matches the PyTorch/DGL forward in f32)
# -----------------------------------------------------------------------------
def _sgc_agg_ref(adj, feat, k=1):
    adj32 = adj.astype(jnp.float32)
    degs = jnp.maximum(jnp.sum(adj32, axis=1), 1.0)
    norm = jax.lax.rsqrt(degs)[:, None]
    h = feat.astype(jnp.float32)
    for _ in range(k):
        h = h * norm
        h = adj32 @ h
        h = h * norm
    return h.astype(feat.dtype)


if __name__ == "__main__":
    key = jax.random.PRNGKey(0)
    k_a1, k_f1, k_a2, k_f2 = jax.random.split(key, 4)

    # bf16 normalized adjacency + bf16 feature stream vs the f32 reference:
    # allow ~1e-2-scale deviation (accumulation is f32; use HIGHEST-precision
    # f32 matmuls if exact SGC is required).
    TOL = dict(atol=5e-2, rtol=5e-2)

    # Case 1: small graph -> auto routes to the fully resident path.
    N1, F1, K1 = 64, 32, 2
    adj1 = (jax.random.uniform(k_a1, (N1, N1)) < 0.1).astype(jnp.float32)
    adj1 = jnp.maximum(adj1, jnp.eye(N1, dtype=jnp.float32))   # self-loops
    feat1 = jax.random.normal(k_f1, (N1, F1), dtype=jnp.float32)

    out1 = jax.block_until_ready(sgc_agg(adj1, feat1, k=K1))
    ref1 = _sgc_agg_ref(adj1, feat1, k=K1)
    assert out1.shape == (N1, F1)
    assert jnp.allclose(out1, ref1, **TOL), "resident path mismatch vs reference"

    # Case 2: ragged shapes, forced tiled/streamed path (padding, (dst, src)
    # grid, accumulator + parallel dst axis).
    N2, F2, K2 = 200, 40, 2
    adj2 = (jax.random.uniform(k_a2, (N2, N2)) < 0.05).astype(jnp.float32)
    adj2 = jnp.maximum(adj2, jnp.eye(N2, dtype=jnp.float32))
    feat2 = jax.random.normal(k_f2, (N2, F2), dtype=jnp.float32)

    out2 = jax.block_until_ready(
        sgc_agg(adj2, feat2, k=K2, tile_m=128, tile_k=128, mode="tiled"))
    ref2 = _sgc_agg_ref(adj2, feat2, k=K2)
    assert out2.shape == (N2, F2)
    assert jnp.allclose(out2, ref2, **TOL), "tiled path mismatch vs reference"

    # Case 3: forced feature-resident path (h + acc in VMEM scratch, adjacency
    # streamed over a (k, dst, src) grid, all hops in one pallas_call).
    out3 = jax.block_until_ready(
        sgc_agg(adj2, feat2, k=K2, tile_m=128, tile_k=128, mode="feat_resident"))
    assert out3.shape == (N2, F2)
    assert jnp.allclose(out3, ref2, **TOL), "feat_resident path mismatch vs reference"

    print("KERNEL_OK")
</pallas_src>

<mosaic_0001>
module attributes {stable_mosaic.version = 11 : i64} {
  func.func @_sgc_resident_kernel(%arg0: i32, %arg1: memref<128x128xbf16, #tpu.memory_space<any>>, %arg2: memref<128x128xbf16, #tpu.memory_space<any>>, %arg3: memref<128x128xf32, #tpu.memory_space<vmem>>, %arg4: memref<128x128xbf16, #tpu.memory_space<vmem>>, %arg5: memref<128x128xbf16, #tpu.memory_space<vmem>>, %arg6: memref<2x!tpu.dma_semaphore, #tpu.memory_space<semaphore_mem>>) attributes {dimension_semantics = [#tpu.dimension_semantics<arbitrary>], iteration_bounds = array<i64: 1>, scalar_prefetch = 0 : i64, scratch_operands = 3 : i64, tpu.core_type = #tpu.core_type<tc>, window_params = [{}, {}, {pipeline_mode = #tpu.pipeline_mode<synchronous>, transform_indices = @transform_2, window_bounds = array<i64: 128, 128>}]} {
    %c0_i32 = arith.constant 0 : i32
    %0 = tpu.memref_slice %arg6[%c0_i32] : memref<2x!tpu.dma_semaphore, #tpu.memory_space<semaphore_mem>> -> memref<1x!tpu.dma_semaphore, #tpu.memory_space<semaphore_mem>>
    %1 = tpu.memref_squeeze %0 : memref<1x!tpu.dma_semaphore, #tpu.memory_space<semaphore_mem>> -> memref<!tpu.dma_semaphore, #tpu.memory_space<semaphore_mem>>
    tpu.enqueue_dma source(%arg1 : memref<128x128xbf16, #tpu.memory_space<any>>) target(%arg4 : memref<128x128xbf16, #tpu.memory_space<vmem>>) target_semaphore(%1 : memref<!tpu.dma_semaphore, #tpu.memory_space<semaphore_mem>>)
    %c1_i32 = arith.constant 1 : i32
    %2 = tpu.memref_slice %arg6[%c1_i32] : memref<2x!tpu.dma_semaphore, #tpu.memory_space<semaphore_mem>> -> memref<1x!tpu.dma_semaphore, #tpu.memory_space<semaphore_mem>>
    %3 = tpu.memref_squeeze %2 : memref<1x!tpu.dma_semaphore, #tpu.memory_space<semaphore_mem>> -> memref<!tpu.dma_semaphore, #tpu.memory_space<semaphore_mem>>
    tpu.enqueue_dma source(%arg2 : memref<128x128xbf16, #tpu.memory_space<any>>) target(%arg5 : memref<128x128xbf16, #tpu.memory_space<vmem>>) target_semaphore(%3 : memref<!tpu.dma_semaphore, #tpu.memory_space<semaphore_mem>>)
    %c0_i32_0 = arith.constant 0 : i32
    %4 = tpu.memref_slice %arg6[%c0_i32_0] : memref<2x!tpu.dma_semaphore, #tpu.memory_space<semaphore_mem>> -> memref<1x!tpu.dma_semaphore, #tpu.memory_space<semaphore_mem>>
    %5 = tpu.memref_squeeze %4 : memref<1x!tpu.dma_semaphore, #tpu.memory_space<semaphore_mem>> -> memref<!tpu.dma_semaphore, #tpu.memory_space<semaphore_mem>>
    tpu.wait_dma2 semaphore(%5 : memref<!tpu.dma_semaphore, #tpu.memory_space<semaphore_mem>>) src(%arg1 : memref<128x128xbf16, #tpu.memory_space<any>>) dst(%arg4 : memref<128x128xbf16, #tpu.memory_space<vmem>>)
    %c1_i32_1 = arith.constant 1 : i32
    %6 = tpu.memref_slice %arg6[%c1_i32_1] : memref<2x!tpu.dma_semaphore, #tpu.memory_space<semaphore_mem>> -> memref<1x!tpu.dma_semaphore, #tpu.memory_space<semaphore_mem>>
    %7 = tpu.memref_squeeze %6 : memref<1x!tpu.dma_semaphore, #tpu.memory_space<semaphore_mem>> -> memref<!tpu.dma_semaphore, #tpu.memory_space<semaphore_mem>>
    tpu.wait_dma2 semaphore(%7 : memref<!tpu.dma_semaphore, #tpu.memory_space<semaphore_mem>>) src(%arg2 : memref<128x128xbf16, #tpu.memory_space<any>>) dst(%arg5 : memref<128x128xbf16, #tpu.memory_space<vmem>>)
    %c0 = arith.constant 0 : index
    %c0_2 = arith.constant 0 : index
    %8 = vector.load %arg4[%c0, %c0_2] : memref<128x128xbf16, #tpu.memory_space<vmem>>, vector<128x128xbf16>
    %c0_3 = arith.constant 0 : index
    %c0_4 = arith.constant 0 : index
    %9 = vector.load %arg5[%c0_3, %c0_4] : memref<128x128xbf16, #tpu.memory_space<vmem>>, vector<128x128xbf16>
    %cst = arith.constant dense<0.000000e+00> : vector<128x128xf32>
    %10 = tpu.matmul %8, %9, %cst {dimension_numbers = #tpu.dot_dimension_numbers<[1], [0], [0], [1], [0, 0, 1, 1], [], []>} : vector<128x128xbf16>, vector<128x128xbf16>, vector<128x128xf32> -> vector<128x128xf32>
    %11 = arith.truncf %10 : vector<128x128xf32> to vector<128x128xbf16>
    %cst_5 = arith.constant dense<0.000000e+00> : vector<128x128xf32>
    %12 = tpu.matmul %8, %11, %cst_5 {dimension_numbers = #tpu.dot_dimension_numbers<[1], [0], [0], [1], [0, 0, 1, 1], [], []>} : vector<128x128xbf16>, vector<128x128xbf16>, vector<128x128xf32> -> vector<128x128xf32>
    %c0_6 = arith.constant 0 : index
    %c0_7 = arith.constant 0 : index
    %13 = vector.load %arg3[%c0_6, %c0_7] : memref<128x128xf32, #tpu.memory_space<vmem>>, vector<128x128xf32>
    tpu.vector_store %arg3[%c0_6, %c0_7], %12 {strides = array<i32>} : memref<128x128xf32, #tpu.memory_space<vmem>>, vector<128x128xf32>,
    return
  }
  func.func @transform_2(%arg0: i32) -> (i32, i32) {
    %c0_i32 = arith.constant 0 : i32
    %c0_i32_0 = arith.constant 0 : i32
    %c0_i32_1 = arith.constant 0 : i32
    return %c0_i32, %c0_i32_0 : i32, i32
  }
}

</mosaic_0001>

<bundles_post_ra>
// kernel: sgc_agg.1
= control target key start
LH: loop header
LB: loop body
LE: loop exit
PB: predicated region body
PF: predicated region fallthrough
CT: control target
= control target key end

     0   :  { %s566_s0 = inlined_call_operand.vmem [shape: bf16[128,128], index: 0, kind: input, shape index: {}]   ;;  %s567_s1 = inlined_call_operand.vmem [shape: bf16[128,128], index: 1, kind: input, shape index: {}]   ;;  %s568_s2 = inlined_call_operand.vmem [shape: f32[128,128], index: 2, kind: output, shape index: {}]  }
   0x1   :  { %v17_v0 = vld [vmem:[%s566_s0] sm:$0xff]  ;;  %v19_v1 = vld [vmem:[%s566_s0 + $0x8] sm:$0xff]  ;;  %v21_v2 = vld [vmem:[%s566_s0 + $0x10] sm:$0xff] }
   0x2   :  { %18 = vst [vmem:[#allocation2 + $0x30] sm:$0xff] %v17_v0  ;;  %v23_v3 = vld [vmem:[%s566_s0 + $0x18] sm:$0xff]  ;;  %v25_v4 = vld [vmem:[%s566_s0 + $0x20] sm:$0xff]  ;;  %v27_v5 = vld [vmem:[%s566_s0 + $0x28] sm:$0xff] }
   0x3   :  { %20 = vst [vmem:[#allocation2] sm:$0xff] %v19_v1  ;;  %v29_v6 = vld [vmem:[%s566_s0 + $0x30] sm:$0xff]  ;;  %v31_v7 = vld [vmem:[%s566_s0 + $0x38] sm:$0xff] }
   0x4   :  { %22 = vst [vmem:[#allocation2 + $0x18] sm:$0xff] %v21_v2 }
   0x5   :  { %24 = vst [vmem:[#allocation2 + $0x10] sm:$0xff] %v23_v3 }
   0x6   :  { %26 = vst [vmem:[#allocation2 + $0x8] sm:$0xff] %v25_v4 }
   0x7   :  { %28 = vst [vmem:[#allocation2 + $0x20] sm:$0xff] %v27_v5 }
   0x8   :  { %30 = vst [vmem:[#allocation2 + $0x28] sm:$0xff] %v29_v6 }
   0x9   :  { %32 = vst [vmem:[#allocation2 + $0x38] sm:$0xff] %v31_v7 }
   0xa   :  { %38 = vsyncadd [#allocation4], 1024  ;;  %v50_v8 = vld [vmem:[%s567_s1] sm:$0xff]  ;;  %v52_v9 = vld [vmem:[%s567_s1 + $0x8] sm:$0xff] }
   0xb   :  { %51 = vst [vmem:[#allocation3] sm:$0xff] %v50_v8  ;;  %v54_v10 = vld [vmem:[%s567_s1 + $0x10] sm:$0xff]  ;;  %v56_v11 = vld [vmem:[%s567_s1 + $0x18] sm:$0xff]  ;;  %v58_v12 = vld [vmem:[%s567_s1 + $0x20] sm:$0xff] }
   0xc   :  { %53 = vst [vmem:[#allocation3 + $0x18] sm:$0xff] %v52_v9  ;;  %v60_v13 = vld [vmem:[%s567_s1 + $0x28] sm:$0xff]  ;;  %v62_v14 = vld [vmem:[%s567_s1 + $0x30] sm:$0xff]  ;;  %v64_v15 = vld [vmem:[%s567_s1 + $0x38] sm:$0xff] }
   0xd   :  { %55 = vst [vmem:[#allocation3 + $0x10] sm:$0xff] %v54_v10 }
   0xe   :  { %57 = vst [vmem:[#allocation3 + $0x20] sm:$0xff] %v56_v11 }
   0xf   :  { %59 = vst [vmem:[#allocation3 + $0x28] sm:$0xff] %v58_v12 }
  0x10   :  { %61 = vst [vmem:[#allocation3 + $0x8] sm:$0xff] %v60_v13 }
  0x11   :  { %63 = vst [vmem:[#allocation3 + $0x30] sm:$0xff] %v62_v14 }
  0x12   :  { %65 = vst [vmem:[#allocation3 + $0x38] sm:$0xff] %v64_v15 }
  0x13   :  { %71 = vsyncadd [#allocation4 + $0x1], 1024 }
  0x14   :  { %451 = dma.done.wait [#allocation4], 1024 }
  0x15   :  { %452 = vsyncadd [#allocation4], 4294966272 }
  0x16   :  { %453 = dma.done.wait [#allocation4 + $0x1], 1024 }
  0x17   :  { %454 = vsyncadd [#allocation4 + $0x1], 4294966272  ;;  %v432_v18 = vld [vmem:[#allocation3 + $0x8] sm:$0xff]  ;;  %v430_v20 = vld [vmem:[#allocation3 + $0x20] sm:$0xff] }
  0x18   :  { %v433_v17 = vld [vmem:[#allocation3 + $0x30] sm:$0xff]  ;;  %v431_v19 = vld [vmem:[#allocation3 + $0x28] sm:$0xff]  ;;  %v428_v22 = vld [vmem:[#allocation3 + $0x18] sm:$0xff] }
  0x19   :  { %v434_v16 = vld [vmem:[#allocation3 + $0x38] sm:$0xff]  ;;  %v429_v21 = vld [vmem:[#allocation3 + $0x10] sm:$0xff]  ;;  %v427_v23 = vld [vmem:[#allocation3] sm:$0xff] }
  0x1a   :  { %435 = vmatpush.bf16.msra.mxu2 %v434_v16  ;;  %206 = vmatpush.bf16.msra.mxu0 %v434_v16  ;;  %v423_v24 = vld [vmem:[#allocation2 + $0x8] sm:$0xff]  ;;  %v419_v25 = vld [vmem:[#allocation2 + $0x30] sm:$0xff]  ;;  %v424_v26 = vld [vmem:[#allocation2 + $0x20] sm:$0xff] }
  0x1b   :  { %v420_v27 = vld [vmem:[#allocation2] sm:$0xff]  ;;  %v425_v28 = vld [vmem:[#allocation2 + $0x28] sm:$0xff]  ;;  %v421_v29 = vld [vmem:[#allocation2 + $0x18] sm:$0xff] }
  0x1c   :  { %v426_v30 = vld [vmem:[#allocation2 + $0x38] sm:$0xff]  ;;  %v422_v31 = vld [vmem:[#allocation2 + $0x10] sm:$0xff] }
  0x1e   :  { %436 = vmatpush.bf16.msra.mxu2 %v433_v17  ;;  %207 = vmatpush.bf16.msra.mxu0 %v433_v17 }
  0x22   :  { %437 = vmatpush.bf16.msra.mxu2 %v432_v18  ;;  %208 = vmatpush.bf16.msra.mxu0 %v432_v18 }
  0x26   :  { %438 = vmatpush.bf16.msra.mxu2 %v431_v19  ;;  %209 = vmatpush.bf16.msra.mxu0 %v431_v19 }
  0x2a   :  { %439 = vmatpush.bf16.msra.mxu2 %v430_v20  ;;  %210 = vmatpush.bf16.msra.mxu0 %v430_v20 }
  0x2e   :  { %440 = vmatpush.bf16.msra.mxu2 %v429_v21  ;;  %211 = vmatpush.bf16.msra.mxu0 %v429_v21 }
  0x32   :  { %441 = vmatpush.bf16.msra.mxu2 %v428_v22  ;;  %212 = vmatpush.bf16.msra.mxu0 %v428_v22 }
  0x36   :  { %442 = vmatpush.bf16.msra.mxu2 %v427_v23  ;;  %213 = vmatpush.bf16.msra.mxu0 %v427_v23 }
  0x39   :  { %234 = vmatmul.bf16.vlgmr.msra.gmra.mxu2 %v423_v24  ;;  %214 = vmatmul.bf16.vlgmr.msra.gmra.mxu0 %v419_v25 }
  0x49   :  { %239 = vmatmul.bf16.gmra.mxu2 %v424_v26  ;;  %219 = vmatmul.bf16.gmra.mxu0 %v420_v27 }
  0x59   :  { %244 = vmatmul.bf16.gmra.mxu2 %v425_v28  ;;  %224 = vmatmul.bf16.gmra.mxu0 %v421_v29 }
  0x69   :  { %249 = vmatmul.bf16.gmra.mxu2 %v426_v30  ;;  %229 = vmatmul.bf16.gmra.mxu0 %v422_v31 }
  0xb6   :  { %v215_v33 = vpop.f32.mrf.mxu0 }
  0xbc   :  { %v235_v32 = vpop.f32.mrf.mxu2 }
  0xbe   :  { %v217_v35 = vpop.f32.mrf.mxu0 }
  0xbf   :  { %v255_v55 = vpack.c.bf16 %v217_v35, %v215_v33 }
  0xc4   :  { %v237_v34 = vpop.f32.mrf.mxu2 }
  0xc5   :  { %v259_v50 = vpack.c.bf16 %v237_v34, %v235_v32 }
  0xc6   :  { %v220_v37 = vpop.f32.mrf.mxu0 }
  0xcc   :  { %v240_v36 = vpop.f32.mrf.mxu2 }
  0xce   :  { %v222_v39 = vpop.f32.mrf.mxu0 }
  0xcf   :  { %v256_v54 = vpack.c.bf16 %v222_v39, %v220_v37 }
  0xd4   :  { %v242_v38 = vpop.f32.mrf.mxu2 }
  0xd5   :  { %v260_v49 = vpack.c.bf16 %v242_v38, %v240_v36 }
  0xd6   :  { %v225_v41 = vpop.f32.mrf.mxu0 }
  0xdc   :  { %v245_v40 = vpop.f32.mrf.mxu2 }
  0xde   :  { %v227_v44 = vpop.f32.mrf.mxu0 }
  0xdf   :  { %v257_v53 = vpack.c.bf16 %v227_v44, %v225_v41 }
  0xe4   :  { %v247_v42 = vpop.f32.mrf.mxu2 }
  0xe5   :  { %v261_v48 = vpack.c.bf16 %v247_v42, %v245_v40 }
  0xe6   :  { %v230_v47 = vpop.f32.mrf.mxu0 }
  0xec   :  { %v250_v43 = vpop.f32.mrf.mxu2 }
  0xee   :  { %v232_v51 = vpop.f32.mrf.mxu0 }
  0xef   :  { %v258_v52 = vpack.c.bf16 %v232_v51, %v230_v47 }
  0xf4   :  { %v252_v45 = vpop.f32.mrf.mxu2 }
  0xf5   :  { %v262_v46 = vpack.c.bf16 %v252_v45, %v250_v43 }
  0xf7   :  { %263 = vmatpush.bf16.msra.mxu1 %v262_v46  ;;  %443 = vmatpush.bf16.msra.mxu3 %v262_v46 }
  0xfb   :  { %264 = vmatpush.bf16.msra.mxu1 %v261_v48  ;;  %444 = vmatpush.bf16.msra.mxu3 %v261_v48 }
  0xff   :  { %265 = vmatpush.bf16.msra.mxu1 %v260_v49  ;;  %445 = vmatpush.bf16.msra.mxu3 %v260_v49 }
 0x103   :  { %266 = vmatpush.bf16.msra.mxu1 %v259_v50  ;;  %446 = vmatpush.bf16.msra.mxu3 %v259_v50 }
 0x107   :  { %267 = vmatpush.bf16.msra.mxu1 %v258_v52  ;;  %447 = vmatpush.bf16.msra.mxu3 %v258_v52 }
 0x10b   :  { %268 = vmatpush.bf16.msra.mxu1 %v257_v53  ;;  %448 = vmatpush.bf16.msra.mxu3 %v257_v53 }
 0x10f   :  { %269 = vmatpush.bf16.msra.mxu1 %v256_v54  ;;  %449 = vmatpush.bf16.msra.mxu3 %v256_v54 }
 0x113   :  { %270 = vmatpush.bf16.msra.mxu1 %v255_v55  ;;  %450 = vmatpush.bf16.msra.mxu3 %v255_v55 }
 0x116   :  { %271 = vmatmul.bf16.vlgmr.msra.gmra.mxu1 %v419_v25  ;;  %291 = vmatmul.bf16.vlgmr.msra.gmra.mxu3 %v423_v24 }
 0x126   :  { %276 = vmatmul.bf16.gmra.mxu1 %v420_v27  ;;  %296 = vmatmul.bf16.gmra.mxu3 %v424_v26 }
 0x136   :  { %281 = vmatmul.bf16.gmra.mxu1 %v421_v29  ;;  %301 = vmatmul.bf16.gmra.mxu3 %v425_v28 }
 0x146   :  { %286 = vmatmul.bf16.gmra.mxu1 %v422_v31  ;;  %306 = vmatmul.bf16.gmra.mxu3 %v426_v30 }
 0x193   :  { %v272_v56 = vpop.f32.mrf.mxu1 }
 0x194   :  { %312 = vst [vmem:[%s568_s2] sm:$0xff] %v272_v56 }
 0x199   :  { %v292_v57 = vpop.f32.mrf.mxu3 }
 0x19a   :  { %320 = vst [vmem:[%s568_s2 + $0x40] sm:$0xff] %v292_v57 }
 0x19b   :  { %v274_v58 = vpop.f32.mrf.mxu1 }
 0x19c   :  { %313 = vst [vmem:[%s568_s2 + $0x8] sm:$0xff] %v274_v58 }
 0x1a1   :  { %v294_v59 = vpop.f32.mrf.mxu3 }
 0x1a2   :  { %321 = vst [vmem:[%s568_s2 + $0x48] sm:$0xff] %v294_v59 }
 0x1a3   :  { %v277_v60 = vpop.f32.mrf.mxu1 }
 0x1a4   :  { %314 = vst [vmem:[%s568_s2 + $0x10] sm:$0xff] %v277_v60 }
 0x1a9   :  { %v297_v61 = vpop.f32.mrf.mxu3 }
 0x1aa   :  { %322 = vst [vmem:[%s568_s2 + $0x50] sm:$0xff] %v297_v61 }
 0x1ab   :  { %v279_v62 = vpop.f32.mrf.mxu1 }
 0x1ac   :  { %315 = vst [vmem:[%s568_s2 + $0x18] sm:$0xff] %v279_v62 }
 0x1b1   :  { %v299_v63 = vpop.f32.mrf.mxu3 }
 0x1b2   :  { %323 = vst [vmem:[%s568_s2 + $0x58] sm:$0xff] %v299_v63 }
 0x1b3   :  { %v282_v0 = vpop.f32.mrf.mxu1 }
 0x1b4   :  { %316 = vst [vmem:[%s568_s2 + $0x20] sm:$0xff] %v282_v0 }
 0x1b9   :  { %v302_v1 = vpop.f32.mrf.mxu3 }
 0x1ba   :  { %324 = vst [vmem:[%s568_s2 + $0x60] sm:$0xff] %v302_v1 }
 0x1bb   :  { %v284_v2 = vpop.f32.mrf.mxu1 }
 0x1bc   :  { %317 = vst [vmem:[%s568_s2 + $0x28] sm:$0xff] %v284_v2 }
 0x1c1   :  { %v304_v3 = vpop.f32.mrf.mxu3 }
 0x1c2   :  { %325 = vst [vmem:[%s568_s2 + $0x68] sm:$0xff] %v304_v3 }
 0x1c3   :  { %v287_v4 = vpop.f32.mrf.mxu1 }
 0x1c4   :  { %318 = vst [vmem:[%s568_s2 + $0x30] sm:$0xff] %v287_v4 }
 0x1c9   :  { %v307_v5 = vpop.f32.mrf.mxu3 }
 0x1ca   :  { %326 = vst [vmem:[%s568_s2 + $0x70] sm:$0xff] %v307_v5 }
 0x1cb   :  { %v289_v6 = vpop.f32.mrf.mxu1 }
 0x1cc   :  { %319 = vst [vmem:[%s568_s2 + $0x38] sm:$0xff] %v289_v6 }
 0x1d1   :  { %v309_v7 = vpop.f32.mrf.mxu3 }
 0x1d2   :  { %327 = vst [vmem:[%s568_s2 + $0x78] sm:$0xff] %v309_v7 }
 0x1d3   :  { %332 = vsyncmov [#allocation4] }
 0x1d6   :  { %s333_s13 = vpop.sfrf %332 }
 0x1d7   :  { %p417_p0 = scmp.ne.s32.totalorder %s333_s13, 0 }
 0x1d9   :  { %337 = shalt.err (%p417_p0)  }
 0x1da   :  { %339 = vsyncmov [#allocation4 + $0x1] }
 0x1dd   :  { %s340_s14 = vpop.sfrf %339 }
 0x1de   :  { %p418_p1 = scmp.ne.s32.totalorder %s340_s14, 0 }
 0x1e0   :  { %344 = shalt.err (%p418_p1)  }

</bundles_post_ra>
